<compile_context>
chip_gen: v6e
topology: v6e:2x2x1
jax: 0.10.0
libtpu: 0.0.40
codegen_flags: <defaults>
</compile_context>

<pallas_src>
import functools

import jax
import jax.numpy as jnp
from jax import lax
from jax.experimental import pallas as pl
from jax.experimental.pallas import tpu as pltpu

LANES = 128
MAX_BLOCK_ROWS = 8192            # 8192x128 f32 = 4 MiB/block; 2 inputs x 2 bufs = 16 MiB
NPLANES = 4                      # [pos_cnt, invalid_cnt, A, B]
PAD_X = -100.0                   # (-100) + softplus(100) == 0 exactly in f32
VMEM_LIMIT_BYTES = 32 * 1024 * 1024


def _round_up(a, b):
    return ((a + b - 1) // b) * b


def _detect_num_tensorcores():
    """Use 2 splits only on 2-TensorCore chips (v7x); on 1-TC v5e/v6e the
    leading 'parallel' axis is just a serial loop + extra work."""
    try:
        d = jax.devices()[0]
        if d.platform == "tpu" and "v7" in d.device_kind.lower():
            return 2
    except Exception:
        pass
    return 1


_NUM_TC = _detect_num_tensorcores()


def _wbce_partial_kernel(x_ref, t_ref, out_ref, *, block_rows, bps, rows,
                         needs_mask):
    """Accumulate 4 partial (8,128) planes per grid split directly in out_ref."""
    i = pl.program_id(1)

    @pl.when(i == 0)
    def _():
        out_ref[...] = jnp.zeros_like(out_ref)

    x = x_ref[...].astype(jnp.float32)
    t = t_ref[...].astype(jnp.float32)

    one = jnp.float32(1.0)
    zero = jnp.float32(0.0)

    nz = t != zero          # contributes to `pos` (the -1 sentinel counts too)
    valid = t != -1.0       # target != -1

    if needs_mask:
        # Ragged grid edge: rows beyond `rows` (or whole clamped duplicate
        # blocks) hold unspecified data and must be excluded from every sum.
        logical_block = pl.program_id(0) * bps + i
        row0 = logical_block * block_rows
        row_idx = lax.broadcasted_iota(jnp.int32, (block_rows, LANES), 0) + row0
        in_bounds = row_idx < rows
        nz = jnp.logical_and(nz, in_bounds)
        valid = jnp.logical_and(valid, in_bounds)
        base = in_bounds.astype(jnp.float32)
    else:
        base = one

    pos_cnt = nz.astype(jnp.float32)
    valid_f = valid.astype(jnp.float32)
    inv_cnt = base - valid_f                       # count of (real) target == -1

    # stable softplus(-x) = max(-x, 0) + log1p(exp(-|x|)); exp/log1p -> EUP slot
    sp = jnp.maximum(-x, zero) + jnp.log1p(jnp.exp(-jnp.abs(x)))
    xsp = x + sp
    # jnp.where (select) so garbage in masked-off lanes can never produce NaN*0.
    a_term = jnp.where(valid, (one - t) * xsp, zero)   # pos_weight-independent
    b_term = jnp.where(valid, t * sp, zero)            # multiplied by pos_weight

    def rowsum8(v):
        # (block_rows, 128) -> (block_rows//8, 8, 128) -> (8, 128)
        return jnp.sum(v.reshape(-1, 8, LANES), axis=0)

    out_ref[0, 0] += rowsum8(pos_cnt)
    out_ref[0, 1] += rowsum8(inv_cnt)
    out_ref[0, 2] += rowsum8(a_term)
    out_ref[0, 3] += rowsum8(b_term)


@functools.partial(jax.jit, static_argnames=("reduction",))
def w_bce_loss_with_na(inp, target, reduction="mean"):
    """Pallas implementation of W_BCELossWithNA.forward."""
    assert reduction in ("mean", "sum")
    n = inp.size
    x = jnp.ravel(inp)
    t = jnp.ravel(target)

    # Lane pad ONLY when n is not a multiple of 128 (the 2-D (rows, 128) view
    # cannot be formed otherwise).  Padded elements contribute exactly 0:
    #   t = 0      -> not pos, not invalid, b_term = 0
    #   x = PAD_X  -> x + softplus(-x) == 0 exactly in f32 -> a_term = 0
    lane_pad = (-n) % LANES
    if lane_pad:
        x = jnp.pad(x, (0, lane_pad), constant_values=PAD_X)
        t = jnp.pad(t, (0, lane_pad), constant_values=0)
    rows = (n + lane_pad) // LANES
    x = x.reshape(rows, LANES)
    t = t.reshape(rows, LANES)

    block_rows = min(MAX_BLOCK_ROWS, _round_up(rows, 8))
    nblocks = pl.cdiv(rows, block_rows)
    num_splits = _NUM_TC if nblocks >= _NUM_TC else 1
    bps = pl.cdiv(nblocks, num_splits)             # blocks per split
    # Logical blocks past nblocks (only when nblocks is odd with 2 splits) get
    # clamped onto the last real block and are fully masked out in-kernel.
    needs_clamp = num_splits * bps != nblocks
    needs_mask = needs_clamp or (rows % block_rows != 0)

    if needs_clamp:
        def idx_map(c, i):
            return (jnp.minimum(c * bps + i, nblocks - 1), 0)
    else:
        def idx_map(c, i):
            return (c * bps + i, 0)

    in_spec = pl.BlockSpec((block_rows, LANES), idx_map)

    kernel = functools.partial(
        _wbce_partial_kernel,
        block_rows=block_rows, bps=bps, rows=rows, needs_mask=needs_mask)

    bytes_accessed = int(x.size) * x.dtype.itemsize + int(t.size) * t.dtype.itemsize

    partials = pl.pallas_call(
        kernel,
        out_shape=jax.ShapeDtypeStruct((num_splits, NPLANES, 8, LANES), jnp.float32),
        grid_spec=pltpu.PrefetchScalarGridSpec(
            num_scalar_prefetch=0,
            grid=(num_splits, bps),
            in_specs=[in_spec, in_spec],
            out_specs=pl.BlockSpec((1, NPLANES, 8, LANES), lambda c, i: (c, 0, 0, 0)),
        ),
        compiler_params=pltpu.CompilerParams(
            dimension_semantics=("parallel", "arbitrary"),
            vmem_limit_bytes=VMEM_LIMIT_BYTES,
        ),
        cost_estimate=pl.CostEstimate(
            flops=15 * n, transcendentals=2 * n, bytes_accessed=bytes_accessed),
    )(x, t)

    sums = jnp.sum(partials, axis=(0, 2, 3))       # (NPLANES,)
    pos, invalid, a_sum, b_sum = sums[0], sums[1], sums[2], sums[3]

    n_f = jnp.float32(n)                 # pos + neg == n exactly (n is static)
    neg = n_f - pos
    n_valid = n_f - invalid
    pos_w = (n_f + 1.0) / (pos + 1.0)
    neg_w = (n_f + 1.0) / (neg + 1.0)
    total = neg_w * (a_sum + pos_w * b_sum)
    if reduction == "mean":
        # NOTE: divides by 0 -> NaN when every element is -1 (matches PyTorch
        # mean over an empty selection).
        total = total / n_valid
    return total


def _ref_loss(x, t, reduction="mean"):
    """Pure-JAX reference mirroring the PyTorch module."""
    x = x.astype(jnp.float32)
    t = t.astype(jnp.float32)
    pos = jnp.sum(t != 0.0).astype(jnp.float32)
    neg = jnp.sum(t == 0.0).astype(jnp.float32)
    pos_w = (pos + neg + 1.0) / (pos + 1.0)
    neg_w = (pos + neg + 1.0) / (neg + 1.0)
    valid = t != -1.0
    sp = jnp.maximum(-x, 0.0) + jnp.log1p(jnp.exp(-jnp.abs(x)))
    per = neg_w * ((1.0 - t) * (x + sp) + pos_w * t * sp)
    per = jnp.where(valid, per, 0.0)
    if reduction == "mean":
        return jnp.sum(per) / jnp.sum(valid).astype(jnp.float32)
    return jnp.sum(per)


if __name__ == "__main__":
    key = jax.random.PRNGKey(0)
    k1, k2, k3, k4 = jax.random.split(key, 4)

    # Main case: NCHW [2, 4, 16, 16] (2048 elements, exactly lane-aligned,
    # zero wrapper-side padding).
    shape = (2, 4, 16, 16)
    logits = jax.random.normal(k1, shape, dtype=jnp.float32)
    target = jax.random.randint(k2, shape, -1, 2).astype(jnp.float32)  # {-1, 0, 1}

    loss = jax.block_until_ready(w_bce_loss_with_na(logits, target))
    ref = jax.block_until_ready(_ref_loss(logits, target))
    assert jnp.allclose(loss, ref, rtol=1e-4, atol=1e-5), (loss, ref)

    loss_s = jax.block_until_ready(w_bce_loss_with_na(logits, target, reduction="sum"))
    ref_s = jax.block_until_ready(_ref_loss(logits, target, reduction="sum"))
    assert jnp.allclose(loss_s, ref_s, rtol=1e-4, atol=1e-4), (loss_s, ref_s)

    # Ragged case (not a multiple of 128): exercises the minimal lane pad and
    # the in-kernel tail-row masking of a partial block.
    shape2 = (3, 5, 17, 13)  # 3315 elements
    logits2 = jax.random.normal(k3, shape2, dtype=jnp.float32)
    target2 = jax.random.randint(k4, shape2, -1, 2).astype(jnp.float32)
    loss2 = jax.block_until_ready(w_bce_loss_with_na(logits2, target2))
    ref2 = jax.block_until_ready(_ref_loss(logits2, target2))
    assert jnp.allclose(loss2, ref2, rtol=1e-4, atol=1e-5), (loss2, ref2)

    print("KERNEL_OK")
</pallas_src>

<mosaic_0001>
module attributes {stable_mosaic.version = 11 : i64} {
  func.func @_wbce_partial_kernel(%arg0: i32, %arg1: i32, %arg2: memref<16x128xf32, #tpu.memory_space<vmem>>, %arg3: memref<16x128xf32, #tpu.memory_space<vmem>>, %arg4: memref<1x4x8x128xf32, #tpu.memory_space<vmem>>) attributes {dimension_semantics = [#tpu.dimension_semantics<parallel>, #tpu.dimension_semantics<arbitrary>], iteration_bounds = array<i64: 1, 1>, scalar_prefetch = 0 : i64, scratch_operands = 0 : i64, tpu.core_type = #tpu.core_type<tc>, window_params = [{transform_indices = @transform_0, window_bounds = array<i64: 16, 128>}, {transform_indices = @transform_1, window_bounds = array<i64: 16, 128>}, {transform_indices = @transform_2, window_bounds = array<i64: 1, 4, 8, 128>}]} {
    %c0_i32 = arith.constant 0 : i32
    %0 = arith.cmpi eq, %arg1, %c0_i32 : i32
    %1 = arith.extui %0 : i1 to i32
    %c0_i32_0 = arith.constant 0 : i32
    %2 = arith.cmpi ne, %1, %c0_i32_0 : i32
    scf.if %2 {
      %cst_45 = arith.constant 0.000000e+00 : f32
      %66 = vector.broadcast %cst_45 : f32 to vector<1x4x8x128xf32>
      %c0_46 = arith.constant 0 : index
      %c0_47 = arith.constant 0 : index
      %c0_48 = arith.constant 0 : index
      %c0_49 = arith.constant 0 : index
      %67 = vector.load %arg4[%c0_46, %c0_47, %c0_48, %c0_49] : memref<1x4x8x128xf32, #tpu.memory_space<vmem>>, vector<1x4x8x128xf32>
      tpu.vector_store %arg4[%c0_46, %c0_47, %c0_48, %c0_49], %66 {strides = array<i32>} : memref<1x4x8x128xf32, #tpu.memory_space<vmem>>, vector<1x4x8x128xf32>,
    } else {
    }
    %c0 = arith.constant 0 : index
    %c0_1 = arith.constant 0 : index
    %3 = vector.load %arg2[%c0, %c0_1] : memref<16x128xf32, #tpu.memory_space<vmem>>, vector<16x128xf32>
    %c0_2 = arith.constant 0 : index
    %c0_3 = arith.constant 0 : index
    %4 = vector.load %arg3[%c0_2, %c0_3] : memref<16x128xf32, #tpu.memory_space<vmem>>, vector<16x128xf32>
    %cst = arith.constant 0.000000e+00 : f32
    %5 = vector.broadcast %cst : f32 to vector<16x128xf32>
    %6 = arith.cmpf one, %4, %5 : vector<16x128xf32>
    %cst_4 = arith.constant -1.000000e+00 : f32
    %7 = vector.broadcast %cst_4 : f32 to vector<16x128xf32>
    %8 = arith.cmpf one, %4, %7 : vector<16x128xf32>
    %9 = arith.extui %6 : vector<16x128xi1> to vector<16x128xi32>
    %10 = arith.sitofp %9 : vector<16x128xi32> to vector<16x128xf32>
    %11 = arith.extui %8 : vector<16x128xi1> to vector<16x128xi32>
    %12 = arith.sitofp %11 : vector<16x128xi32> to vector<16x128xf32>
    %cst_5 = arith.constant 1.000000e+00 : f32
    %13 = vector.broadcast %cst_5 : f32 to vector<16x128xf32>
    %14 = arith.subf %13, %12 : vector<16x128xf32>
    %cst_6 = arith.constant 0.000000e+00 : f32
    %15 = vector.broadcast %cst_6 : f32 to vector<16x128xf32>
    %16 = arith.subf %15, %3 : vector<16x128xf32>
    %cst_7 = arith.constant 0.000000e+00 : f32
    %17 = vector.broadcast %cst_7 : f32 to vector<16x128xf32>
    %18 = arith.maximumf %16, %17 : vector<16x128xf32>
    %19 = math.absf %3 : vector<16x128xf32>
    %cst_8 = arith.constant 0.000000e+00 : f32
    %20 = vector.broadcast %cst_8 : f32 to vector<16x128xf32>
    %21 = arith.subf %20, %19 : vector<16x128xf32>
    %22 = math.exp %21 : vector<16x128xf32>
    %23 = math.log1p %22 : vector<16x128xf32>
    %24 = arith.addf %18, %23 : vector<16x128xf32>
    %25 = arith.addf %3, %24 : vector<16x128xf32>
    %cst_9 = arith.constant 1.000000e+00 : f32
    %26 = vector.broadcast %cst_9 : f32 to vector<16x128xf32>
    %27 = arith.subf %26, %4 : vector<16x128xf32>
    %28 = arith.mulf %27, %25 : vector<16x128xf32>
    %cst_10 = arith.constant 0.000000e+00 : f32
    %29 = vector.broadcast %cst_10 : f32 to vector<16x128xf32>
    %30 = arith.select %8, %28, %29 : vector<16x128xi1>, vector<16x128xf32>
    %31 = arith.mulf %4, %24 : vector<16x128xf32>
    %cst_11 = arith.constant 0.000000e+00 : f32
    %32 = vector.broadcast %cst_11 : f32 to vector<16x128xf32>
    %33 = arith.select %8, %31, %32 : vector<16x128xi1>, vector<16x128xf32>
    %c0_12 = arith.constant 0 : index
    %c0_13 = arith.constant 0 : index
    %c0_14 = arith.constant 0 : index
    %c0_15 = arith.constant 0 : index
    %34 = vector.load %arg4[%c0_12, %c0_13, %c0_14, %c0_15] : memref<1x4x8x128xf32, #tpu.memory_space<vmem>>, vector<1x1x8x128xf32>
    %35 = vector.shape_cast %34 : vector<1x1x8x128xf32> to vector<8x128xf32>
    %36 = vector.shape_cast %10 : vector<16x128xf32> to vector<2x8x128xf32>
    %cst_16 = arith.constant dense<0.000000e+00> : vector<8x128xf32>
    %37 = vector.multi_reduction <add>, %36, %cst_16 [0] : vector<2x8x128xf32> to vector<8x128xf32>
    %38 = arith.addf %35, %37 : vector<8x128xf32>
    %c0_17 = arith.constant 0 : index
    %c0_18 = arith.constant 0 : index
    %c0_19 = arith.constant 0 : index
    %c0_20 = arith.constant 0 : index
    %39 = vector.load %arg4[%c0_17, %c0_18, %c0_19, %c0_20] : memref<1x4x8x128xf32, #tpu.memory_space<vmem>>, vector<1x1x8x128xf32>
    %40 = vector.shape_cast %39 : vector<1x1x8x128xf32> to vector<8x128xf32>
    %41 = vector.shape_cast %38 : vector<8x128xf32> to vector<1x1x8x128xf32>
    tpu.vector_store %arg4[%c0_17, %c0_18, %c0_19, %c0_20], %41 {strides = array<i32>} : memref<1x4x8x128xf32, #tpu.memory_space<vmem>>, vector<1x1x8x128xf32>,
    %c0_21 = arith.constant 0 : index
    %c1 = arith.constant 1 : index
    %c0_22 = arith.constant 0 : index
    %c0_23 = arith.constant 0 : index
    %42 = vector.load %arg4[%c0_21, %c1, %c0_22, %c0_23] : memref<1x4x8x128xf32, #tpu.memory_space<vmem>>, vector<1x1x8x128xf32>
    %43 = vector.shape_cast %42 : vector<1x1x8x128xf32> to vector<8x128xf32>
    %44 = vector.shape_cast %14 : vector<16x128xf32> to vector<2x8x128xf32>
    %cst_24 = arith.constant dense<0.000000e+00> : vector<8x128xf32>
    %45 = vector.multi_reduction <add>, %44, %cst_24 [0] : vector<2x8x128xf32> to vector<8x128xf32>
    %46 = arith.addf %43, %45 : vector<8x128xf32>
    %c0_25 = arith.constant 0 : index
    %c1_26 = arith.constant 1 : index
    %c0_27 = arith.constant 0 : index
    %c0_28 = arith.constant 0 : index
    %47 = vector.load %arg4[%c0_25, %c1_26, %c0_27, %c0_28] : memref<1x4x8x128xf32, #tpu.memory_space<vmem>>, vector<1x1x8x128xf32>
    %48 = vector.shape_cast %47 : vector<1x1x8x128xf32> to vector<8x128xf32>
    %49 = vector.shape_cast %46 : vector<8x128xf32> to vector<1x1x8x128xf32>
    tpu.vector_store %arg4[%c0_25, %c1_26, %c0_27, %c0_28], %49 {strides = array<i32>} : memref<1x4x8x128xf32, #tpu.memory_space<vmem>>, vector<1x1x8x128xf32>,
    %c0_29 = arith.constant 0 : index
    %c2 = arith.constant 2 : index
    %c0_30 = arith.constant 0 : index
    %c0_31 = arith.constant 0 : index
    %50 = vector.load %arg4[%c0_29, %c2, %c0_30, %c0_31] : memref<1x4x8x128xf32, #tpu.memory_space<vmem>>, vector<1x1x8x128xf32>
    %51 = vector.shape_cast %50 : vector<1x1x8x128xf32> to vector<8x128xf32>
    %52 = vector.shape_cast %30 : vector<16x128xf32> to vector<2x8x128xf32>
    %cst_32 = arith.constant dense<0.000000e+00> : vector<8x128xf32>
    %53 = vector.multi_reduction <add>, %52, %cst_32 [0] : vector<2x8x128xf32> to vector<8x128xf32>
    %54 = arith.addf %51, %53 : vector<8x128xf32>
    %c0_33 = arith.constant 0 : index
    %c2_34 = arith.constant 2 : index
    %c0_35 = arith.constant 0 : index
    %c0_36 = arith.constant 0 : index
    %55 = vector.load %arg4[%c0_33, %c2_34, %c0_35, %c0_36] : memref<1x4x8x128xf32, #tpu.memory_space<vmem>>, vector<1x1x8x128xf32>
    %56 = vector.shape_cast %55 : vector<1x1x8x128xf32> to vector<8x128xf32>
    %57 = vector.shape_cast %54 : vector<8x128xf32> to vector<1x1x8x128xf32>
    tpu.vector_store %arg4[%c0_33, %c2_34, %c0_35, %c0_36], %57 {strides = array<i32>} : memref<1x4x8x128xf32, #tpu.memory_space<vmem>>, vector<1x1x8x128xf32>,
    %c0_37 = arith.constant 0 : index
    %c3 = arith.constant 3 : index
    %c0_38 = arith.constant 0 : index
    %c0_39 = arith.constant 0 : index
    %58 = vector.load %arg4[%c0_37, %c3, %c0_38, %c0_39] : memref<1x4x8x128xf32, #tpu.memory_space<vmem>>, vector<1x1x8x128xf32>
    %59 = vector.shape_cast %58 : vector<1x1x8x128xf32> to vector<8x128xf32>
    %60 = vector.shape_cast %33 : vector<16x128xf32> to vector<2x8x128xf32>
    %cst_40 = arith.constant dense<0.000000e+00> : vector<8x128xf32>
    %61 = vector.multi_reduction <add>, %60, %cst_40 [0] : vector<2x8x128xf32> to vector<8x128xf32>
    %62 = arith.addf %59, %61 : vector<8x128xf32>
    %c0_41 = arith.constant 0 : index
    %c3_42 = arith.constant 3 : index
    %c0_43 = arith.constant 0 : index
    %c0_44 = arith.constant 0 : index
    %63 = vector.load %arg4[%c0_41, %c3_42, %c0_43, %c0_44] : memref<1x4x8x128xf32, #tpu.memory_space<vmem>>, vector<1x1x8x128xf32>
    %64 = vector.shape_cast %63 : vector<1x1x8x128xf32> to vector<8x128xf32>
    %65 = vector.shape_cast %62 : vector<8x128xf32> to vector<1x1x8x128xf32>
    tpu.vector_store %arg4[%c0_41, %c3_42, %c0_43, %c0_44], %65 {strides = array<i32>} : memref<1x4x8x128xf32, #tpu.memory_space<vmem>>, vector<1x1x8x128xf32>,
    return
  }
  func.func @transform_0(%arg0: i32, %arg1: i32) -> (i32, i32) {
    %c1_i32 = arith.constant 1 : i32
    %0 = arith.muli %arg0, %c1_i32 : i32
    %1 = arith.addi %0, %arg1 : i32
    %c0_i32 = arith.constant 0 : i32
    %c0_i32_0 = arith.constant 0 : i32
    return %1, %c0_i32 : i32, i32
  }
  func.func @transform_1(%arg0: i32, %arg1: i32) -> (i32, i32) {
    %c1_i32 = arith.constant 1 : i32
    %0 = arith.muli %arg0, %c1_i32 : i32
    %1 = arith.addi %0, %arg1 : i32
    %c0_i32 = arith.constant 0 : i32
    %c0_i32_0 = arith.constant 0 : i32
    return %1, %c0_i32 : i32, i32
  }
  func.func @transform_2(%arg0: i32, %arg1: i32) -> (i32, i32, i32, i32) {
    %c0_i32 = arith.constant 0 : i32
    %c0_i32_0 = arith.constant 0 : i32
    %c0_i32_1 = arith.constant 0 : i32
    %c0_i32_2 = arith.constant 0 : i32
    return %arg0, %c0_i32, %c0_i32_0, %c0_i32_1 : i32, i32, i32, i32
  }
}

</mosaic_0001>

<bundles_post_ra>
// kernel: w_bce_loss_with_na.1
= control target key start
LH: loop header
LB: loop body
LE: loop exit
PB: predicated region body
PF: predicated region fallthrough
CT: control target
= control target key end

     0   :  { %v179_v4 = vmov 0.0   ;;  %s243_s1 = inlined_call_operand.vmem [shape: f32[16,128], index: 1, kind: input, shape index: {}]   ;;  %s244_s0 = inlined_call_operand.vmem [shape: f32[16,128], index: 0, kind: input, shape index: {}]   ;;  %s245_s2 = inlined_call_operand.vmem [shape: f32[1,4,8,128], index: 2, kind: output, shape index: {}]  }
   0x1   :  { %v198_v0 = vld [vmem:[%s243_s1] sm:$0xff]  ;;  %v203_v1 = vld [vmem:[%s243_s1 + $0x8] sm:$0xff] }
   0x2   :  { %vm67_vm0 = vcmp.ne.f32.partialorder %v198_v0, 0.0  ;;  %vm68_vm1 = vcmp.ne.f32.partialorder %v203_v1, 0.0  ;;  %vm69_vm2 = vcmp.ne.f32.partialorder %v198_v0, -1.0  ;;  %vm70_vm3 = vcmp.ne.f32.partialorder %v203_v1, -1.0  ;;  %v63_v2 = vld [vmem:[%s244_s0] sm:$0xff]  ;;  %v64_v3 = vld [vmem:[%s244_s0 + $0x8] sm:$0xff] }
   0x3   :  { %v160_v5 = vsel %vm67_vm0, 1.0, %v179_v4  ;;  %v161_v6 = vsel %vm68_vm1, 1.0, %v179_v4  ;;  %v162_v7 = vsel %vm69_vm2, 1.0, %v179_v4  ;;  %v163_v8 = vsel %vm70_vm3, 1.0, %v179_v4 }
   0x4   :  { %v126_v9 = vadd.f32 %v161_v6, %v160_v5  ;;  %v79_v10 = vsub.f32 1.0, %v162_v7  ;;  %v80_v11 = vsub.f32 1.0, %v163_v8  ;;  %v85_v12 = vand.u32 2147483647, %v63_v2 }
   0x5   :  { %v86_v13 = vand.u32 2147483647, %v64_v3  ;;  %v81_v26 = vsub.f32 0.0, %v63_v2  ;;  %v82_v29 = vsub.f32 0.0, %v64_v3  ;;  %v115_v42 = vsub.f32 1.0, %v198_v0 }
   0x6   :  { %v131_v14 = vadd.f32 %v80_v11, %v79_v10  ;;  %v87_v15 = vsub.f32 0.0, %v85_v12  ;;  %128 = vst [vmem:[%s245_s2] sm:$0xff] %v126_v9  ;;  %v116_v44 = vsub.f32 1.0, %v203_v1 }
   0x7   :  { %v88_v16 = vsub.f32 0.0, %v86_v13  ;;  %v83_v33 = vmax.f32 %v81_v26, 0.0  ;;  %v84_v36 = vmax.f32 %v82_v29, 0.0 }
   0x8   :  { %v89_v17 = vmul.f32 1.442695, %v87_v15  ;;  %165 = vst [vmem:[%s245_s2 + $0x8] sm:$0xff] %v131_v14 }
   0x9   :  { %v91_v18 = vmul.f32 1.442695, %v88_v16 }
   0xa   :  { %171 = vpow2.f32 %v89_v17 }
   0xb   :  { %173 = vpow2.f32 %v91_v18 }
  0x17   :  { %v172_v19 = vpop.eup %171 }
  0x18   :  { %v174_v20 = vpop.eup %173  ;;  %v93_v21 = vadd.f32 1.0, %v172_v19  ;;  %v96_v23 = vmul.f32 -0.5, %v172_v19  ;;  %v99_v27 = vand.u32 2147483647, %v172_v19 }
  0x19   :  { %v102_v22 = vadd.f32 1.0, %v174_v20  ;;  %v105_v24 = vmul.f32 -0.5, %v174_v20  ;;  %v108_v30 = vand.u32 2147483647, %v174_v20 }
  0x1a   :  { %175 = vlog2.f32 %v93_v21  ;;  %v97_v25 = vadd.f32 1.0, %v96_v23  ;;  %vm100_vm4 = vcmp.lt.f32.partialorder %v99_v27, 0.0004427343 }
  0x1b   :  { %177 = vlog2.f32 %v102_v22  ;;  %v106_v28 = vadd.f32 1.0, %v105_v24  ;;  %vm109_vm5 = vcmp.lt.f32.partialorder %v108_v30, 0.0004427343 }
  0x1c   :  { %v98_v31 = vmul.f32 %v172_v19, %v97_v25 }
  0x1d   :  { %v107_v34 = vmul.f32 %v174_v20, %v106_v28 }
  0x27   :  { %v176_v32 = vpop.eup %175 }
  0x28   :  { %v178_v35 = vpop.eup %177  ;;  %v95_v37 = vmul.f32 0.6931472, %v176_v32 }
  0x29   :  { %v104_v38 = vmul.f32 0.6931472, %v178_v35 }
  0x2a   :  { %v101_v39 = vsel %vm100_vm4, %v98_v31, %v95_v37 }
  0x2b   :  { %v110_v40 = vsel %vm109_vm5, %v107_v34, %v104_v38  ;;  %v111_v41 = vadd.f32 %v101_v39, %v83_v33 }
  0x2c   :  { %v112_v43 = vadd.f32 %v110_v40, %v84_v36 }
  0x2d   :  { %v113_v45 = vadd.f32 %v111_v41, %v63_v2  ;;  %v121_v46 = vmul.f32 %v111_v41, %v198_v0 }
  0x2e   :  { %v114_v47 = vadd.f32 %v112_v43, %v64_v3  ;;  %v122_v48 = vmul.f32 %v112_v43, %v203_v1 }
  0x2f   :  { %v117_v49 = vmul.f32 %v115_v42, %v113_v45  ;;  %v123_v50 = vsel %vm69_vm2, %v121_v46, 0.0 }
  0x30   :  { %v118_v51 = vmul.f32 %v116_v44, %v114_v47  ;;  %v124_v52 = vsel %vm70_vm3, %v122_v48, 0.0 }
  0x31   :  { %v119_v53 = vsel %vm69_vm2, %v117_v49, 0.0  ;;  %v141_v54 = vadd.f32 %v124_v52, %v123_v50 }
  0x32   :  { %v120_v55 = vsel %vm70_vm3, %v118_v51, 0.0 }
  0x33   :  { %v136_v56 = vadd.f32 %v120_v55, %v119_v53  ;;  %169 = vst [vmem:[%s245_s2 + $0x18] sm:$0xff] %v141_v54 }
  0x35   :  { %167 = vst [vmem:[%s245_s2 + $0x10] sm:$0xff] %v136_v56 }

</bundles_post_ra>
